<compile_context>
chip_gen: v7x
topology: tpu7x:2x2x1
jax: 0.10.0
libtpu: 0.0.40
codegen_flags: <defaults>
</compile_context>

<pallas_src>
import functools
import math

import jax
import jax.numpy as jnp
from jax.experimental import pallas as pl
from jax.experimental.pallas import tpu as pltpu


# ---------------------------------------------------------------------------
# Tiling helpers
# ---------------------------------------------------------------------------

# ~2 MiB of f32-equivalent data per block.  Sizing by *elements* (not input
# bytes) bounds the f32 intermediates (x, xc, xc^2, y) the kernels materialize,
# so double-buffered in+out plus temporaries stays well under the VMEM limit
# even for bf16 inputs.
_TARGET_ELEMS = (2 << 20) // 4
# Only force >=2 grid steps (v7x megacore) once the slab is at least this big.
_SPLIT_MIN_ELEMS = _TARGET_ELEMS
_VMEM_LIMIT_BYTES = 32 * 1024 * 1024


def _ceil_div(a, b):
    return -(-a // b)


def _round_up(a, m):
    return _ceil_div(a, m) * m


def _sublane_multiple(itemsize):
    # Packed sublane multiple: (8,128) f32, (16,128) bf16, (32,128) int8/fp8.
    return {1: 32, 2: 16}.get(itemsize, 8)


def _row_tile(n_rows, n_cols, itemsize):
    """Row tile for an (R, C) slab: packed-sublane multiple, or full extent."""
    sub = _sublane_multiple(itemsize)
    total = n_rows * n_cols
    ntiles = max(1, _ceil_div(total, _TARGET_ELEMS))
    tr = _round_up(_ceil_div(n_rows, ntiles), sub)
    if tr < n_rows:
        return tr
    # Whole slab fits in one block: split in two for v7x megacore if worth it.
    if total >= _SPLIT_MIN_ELEMS:
        half = _round_up(_ceil_div(n_rows, 2), sub)
        if half < n_rows:
            return half
    return n_rows


def _lane_tile(hw, c, itemsize):
    """Lane tile for a (1, C, HW) slab: multiple of 128, or full extent."""
    del itemsize
    total = hw * c
    ntiles = max(1, _ceil_div(total, _TARGET_ELEMS))
    tl = _round_up(_ceil_div(hw, ntiles), 128)
    if tl < hw:
        return tl
    if total >= _SPLIT_MIN_ELEMS:
        half = _round_up(_ceil_div(hw, 2), 128)
        if half < hw:
            return half
    return hw


def _batch_tile(b, c, hw):
    """Batch tile for a (B, C, HW) slab when C*HW is small (leading dim: no
    sublane/lane alignment constraint)."""
    per_image = max(1, c * hw)
    tb = min(b, max(1, _TARGET_ELEMS // per_image))
    if tb >= b and b > 1 and b * per_image >= _SPLIT_MIN_ELEMS:
        tb = _ceil_div(b, 2)
    return tb


def _compiler_params(semantics):
    return pltpu.CompilerParams(dimension_semantics=semantics,
                                vmem_limit_bytes=_VMEM_LIMIT_BYTES)


@functools.lru_cache(maxsize=None)
def _grouped_gc_cap():
    """Max packed lane width (g*C) for the grouped small-C path so the two
    segmented-sum matmuls (3 bf16 passes each) stay hidden under DMA."""
    try:
        kind = jax.devices()[0].device_kind.lower()
    except Exception:
        return 512
    if any(v in kind for v in ("v2", "v3", "v4", "v5")):
        return 256      # 128x128-MXU generations
    return 512          # 256-wide MXU (v6e / v7x)


# ---------------------------------------------------------------------------
# Kernels
# ---------------------------------------------------------------------------

def _ln_rows_kernel(x_ref, w_ref, b_ref, o_ref, *, eps):
    """Per-row LayerNorm over the last (lane) axis.  x_ref: (TR, C); w/b f32."""
    x = x_ref[...].astype(jnp.float32)
    mean = jnp.mean(x, axis=-1, keepdims=True)
    xc = x - mean
    var = jnp.mean(xc * xc, axis=-1, keepdims=True)       # biased variance
    inv = jax.lax.rsqrt(var + eps)
    o_ref[...] = (xc * inv * w_ref[...] + b_ref[...]).astype(o_ref.dtype)


def _split_masked_matmul(x, m_bf16, n_terms):
    """x @ m for a 0/1 bf16 mask via `n_terms` bf16 MXU passes.

    The mask entries are exactly representable in bf16, and splitting x into
    hi/mid/lo bf16 terms recovers its mantissa (n_terms=3 covers all 24 f32
    bits), so the product is exact up to f32 accumulation — at half the MXU
    passes of a Precision.HIGHEST f32 matmul.
    """
    acc = None
    rem = x
    for t in range(n_terms):
        part = rem.astype(jnp.bfloat16)
        d = jnp.dot(part, m_bf16, preferred_element_type=jnp.float32)
        acc = d if acc is None else acc + d
        if t + 1 < n_terms:
            rem = rem - part.astype(jnp.float32)
    return acc


def _ln_grouped_kernel(x_ref, m_ref, w_ref, b_ref, o_ref, *, c, eps,
                       x_terms, sq_terms):
    """Lane-dense LayerNorm for small C.

    Each kernel row packs g = GC // c independent logical rows side by side
    (GC is a multiple of 128 -> unmasked, lane-dense loads/stores).  The
    block-diagonal 0/1 matrix m (GC, GC) performs the segmented sum AND the
    per-group broadcast in one MXU matmul, avoiding XLU lane reductions and
    masked sub-128-lane stores.
    """
    x = x_ref[...].astype(jnp.float32)                     # (TR, GC)
    m = m_ref[...]                                         # (GC, GC) bf16 0/1
    inv_c = 1.0 / float(c)
    mean = _split_masked_matmul(x, m, x_terms) * inv_c
    xc = x - mean
    var = _split_masked_matmul(xc * xc, m, sq_terms) * inv_c
    inv = jax.lax.rsqrt(var + eps)
    o_ref[...] = (xc * inv * w_ref[...] + b_ref[...]).astype(o_ref.dtype)


def _ln_cfirst_kernel(x_ref, w_ref, b_ref, o_ref, *, eps):
    """channels_first LayerNorm: x_ref (TB, C, TL); reduce over the sublane C
    axis; the lane dim is spatial (transpose-free)."""
    x = x_ref[...].astype(jnp.float32)
    mean = jnp.mean(x, axis=1, keepdims=True)              # (TB, 1, TL)
    xc = x - mean
    var = jnp.mean(xc * xc, axis=1, keepdims=True)
    inv = jax.lax.rsqrt(var + eps)
    o_ref[...] = (xc * inv * w_ref[...] + b_ref[...]).astype(o_ref.dtype)


# ---------------------------------------------------------------------------
# pallas_call wrappers
# ---------------------------------------------------------------------------

def _ln_rows_plain(x2d, weight, bias, eps):
    R, C = x2d.shape
    tr = _row_tile(R, C, x2d.dtype.itemsize)
    w2d = weight.astype(jnp.float32).reshape(1, C)
    b2d = bias.astype(jnp.float32).reshape(1, C)
    return pl.pallas_call(
        functools.partial(_ln_rows_kernel, eps=eps),
        out_shape=jax.ShapeDtypeStruct((R, C), x2d.dtype),
        grid_spec=pltpu.PrefetchScalarGridSpec(
            num_scalar_prefetch=0,
            grid=(pl.cdiv(R, tr),),
            in_specs=[
                pl.BlockSpec((tr, C), lambda i: (i, 0)),
                pl.BlockSpec((1, C), lambda i: (0, 0)),
                pl.BlockSpec((1, C), lambda i: (0, 0)),
            ],
            out_specs=pl.BlockSpec((tr, C), lambda i: (i, 0)),
        ),
        compiler_params=_compiler_params(("parallel",)),
    )(x2d, w2d, b2d)


def _ln_rows_grouped(x2d, weight, bias, eps, g):
    R, C = x2d.shape
    GC = g * C
    Rg = R // g
    xg = x2d.reshape(Rg, GC)                               # contiguous: free
    tr = _row_tile(Rg, GC, x2d.dtype.itemsize)

    # Block-diagonal 0/1 mask (bf16-exact): M[k1, k2] = 1 iff k1//C == k2//C.
    gid = jnp.arange(GC, dtype=jnp.int32) // C
    m = (gid[:, None] == gid[None, :]).astype(jnp.bfloat16)
    wt = jnp.tile(weight.astype(jnp.float32), g).reshape(1, GC)
    bt = jnp.tile(bias.astype(jnp.float32), g).reshape(1, GC)

    is_bf16 = x2d.dtype == jnp.bfloat16
    x_terms = 1 if is_bf16 else 3          # bf16 input: one exact pass
    sq_terms = 2 if is_bf16 else 3         # xc^2 is f32; bf16 output only needs 2

    out = pl.pallas_call(
        functools.partial(_ln_grouped_kernel, c=C, eps=eps,
                          x_terms=x_terms, sq_terms=sq_terms),
        out_shape=jax.ShapeDtypeStruct((Rg, GC), x2d.dtype),
        grid_spec=pltpu.PrefetchScalarGridSpec(
            num_scalar_prefetch=0,
            grid=(pl.cdiv(Rg, tr),),
            in_specs=[
                pl.BlockSpec((tr, GC), lambda i: (i, 0)),
                pl.BlockSpec((GC, GC), lambda i: (0, 0)),  # resident across steps
                pl.BlockSpec((1, GC), lambda i: (0, 0)),
                pl.BlockSpec((1, GC), lambda i: (0, 0)),
            ],
            out_specs=pl.BlockSpec((tr, GC), lambda i: (i, 0)),
        ),
        compiler_params=_compiler_params(("parallel",)),
    )(xg, m, wt, bt)
    return out.reshape(R, C)


def _ln_channels_last_2d(x2d, weight, bias, eps):
    R, C = x2d.shape
    g = 128 // math.gcd(C, 128)            # smallest g with (g*C) % 128 == 0
    if g > 1 and g * C <= _grouped_gc_cap() and R >= g:
        rm = (R // g) * g
        y_main = _ln_rows_grouped(x2d[:rm], weight, bias, eps, g)
        if rm == R:
            return y_main
        # Only the <= g-1 remainder rows go through the (masked-lane) plain path.
        y_tail = _ln_rows_plain(x2d[rm:], weight, bias, eps)
        return jnp.concatenate([y_main, y_tail], axis=0)
    return _ln_rows_plain(x2d, weight, bias, eps)


def _ln_channels_first(x, weight, bias, eps):
    B, C, H, W = x.shape
    HW = H * W
    x3 = x.reshape(B, C, HW)                               # contiguous: free
    w3 = weight.astype(jnp.float32).reshape(1, C, 1)
    b3 = bias.astype(jnp.float32).reshape(1, C, 1)

    per_image_elems = C * HW
    if per_image_elems >= _TARGET_ELEMS // 2 or B == 1:
        # Large spatial extent: one image per step, tile the spatial (lane) axis.
        tb, tl = 1, _lane_tile(HW, C, x.dtype.itemsize)
    else:
        # Small spatial extent (e.g. ConvNeXt 14x14 / 7x7 stages): tile the
        # batch axis so each grid step moves ~2 MiB instead of one tiny block
        # per image.  Last two block dims equal the full array dims -> legal.
        tb, tl = _batch_tile(B, C, HW), HW

    out = pl.pallas_call(
        functools.partial(_ln_cfirst_kernel, eps=eps),
        out_shape=jax.ShapeDtypeStruct((B, C, HW), x.dtype),
        grid_spec=pltpu.PrefetchScalarGridSpec(
            num_scalar_prefetch=0,
            grid=(pl.cdiv(B, tb), pl.cdiv(HW, tl)),
            in_specs=[
                pl.BlockSpec((tb, C, tl), lambda b, j: (b, 0, j)),
                pl.BlockSpec((1, C, 1), lambda b, j: (0, 0, 0)),
                pl.BlockSpec((1, C, 1), lambda b, j: (0, 0, 0)),
            ],
            out_specs=pl.BlockSpec((tb, C, tl), lambda b, j: (b, 0, j)),
        ),
        compiler_params=_compiler_params(("parallel", "parallel")),
    )(x3, w3, b3)
    return out.reshape(B, C, H, W)


# ---------------------------------------------------------------------------
# Module
# ---------------------------------------------------------------------------

class LayerNorm:
    """JAX/Pallas port of the ConvNeXt LayerNorm (channels_last / channels_first)."""

    def __init__(self, normalized_shape, eps=1e-6, data_format="channels_last",
                 weight=None, bias=None):
        if data_format not in ("channels_last", "channels_first"):
            raise NotImplementedError
        self.eps = float(eps)
        self.data_format = data_format
        c = int(normalized_shape)
        self.normalized_shape = (c,)
        self.weight = jnp.ones((c,), jnp.float32) if weight is None else weight
        self.bias = jnp.zeros((c,), jnp.float32) if bias is None else bias

    def __call__(self, x):
        C = self.normalized_shape[0]
        if self.data_format == "channels_last":
            assert x.shape[-1] == C
            lead = x.shape[:-1]
            x2d = x.reshape(-1, C)
            y = _ln_channels_last_2d(x2d, self.weight, self.bias, self.eps)
            return y.reshape(*lead, C)
        else:
            B, Cx, H, W = x.shape
            assert Cx == C
            return _ln_channels_first(x, self.weight, self.bias, self.eps)


# ---------------------------------------------------------------------------
# Reference + test
# ---------------------------------------------------------------------------

def _reference(x, weight, bias, eps, data_format):
    if data_format == "channels_last":
        u = jnp.mean(x, axis=-1, keepdims=True)
        s = jnp.mean((x - u) ** 2, axis=-1, keepdims=True)
        xn = (x - u) / jnp.sqrt(s + eps)
        return xn * weight + bias
    else:
        u = jnp.mean(x, axis=1, keepdims=True)
        s = jnp.mean((x - u) ** 2, axis=1, keepdims=True)
        xn = (x - u) / jnp.sqrt(s + eps)
        return weight[None, :, None, None] * xn + bias[None, :, None, None]


if __name__ == "__main__":
    key = jax.random.PRNGKey(0)
    keys = jax.random.split(key, 10)
    eps = 1e-6

    def make_params(c, k):
        kw, kb = jax.random.split(k)
        w = 1.0 + 0.1 * jax.random.normal(kw, (c,), jnp.float32)
        b = 0.1 * jax.random.normal(kb, (c,), jnp.float32)
        return w, b

    C = 32
    w, b = make_params(C, keys[0])

    # 1) channels_first NCHW (2, 32, 8, 8) — batch-tiled sublane-reduce kernel.
    ln_cf = LayerNorm(C, eps=eps, data_format="channels_first", weight=w, bias=b)
    x = jax.random.normal(keys[1], (2, C, 8, 8), jnp.float32)
    y = jax.block_until_ready(ln_cf(x))
    assert y.shape == x.shape
    assert jnp.allclose(y, _reference(x, w, b, eps, "channels_first"),
                        atol=1e-5, rtol=1e-5)

    # 2) channels_first, odd spatial size (full-extent lane blocks).
    x = jax.random.normal(keys[2], (2, C, 13, 13), jnp.float32)
    y = jax.block_until_ready(ln_cf(x))
    assert jnp.allclose(y, _reference(x, w, b, eps, "channels_first"),
                        atol=1e-5, rtol=1e-5)

    # 3) channels_last NHWC (2, 8, 8, 32) — lane-dense grouped kernel (g=4, GC=128).
    ln_cl = LayerNorm(C, eps=eps, data_format="channels_last", weight=w, bias=b)
    x = jax.random.normal(keys[3], (2, 8, 8, C), jnp.float32)
    y = jax.block_until_ready(ln_cl(x))
    assert jnp.allclose(y, _reference(x, w, b, eps, "channels_last"),
                        atol=1e-5, rtol=1e-5)

    # 4) channels_last with R % g != 0 (R=18, g=4) — grouped bulk + plain tail.
    x = jax.random.normal(keys[4], (2, 3, 3, C), jnp.float32)
    y = jax.block_until_ready(ln_cl(x))
    assert jnp.allclose(y, _reference(x, w, b, eps, "channels_last"),
                        atol=1e-5, rtol=1e-5)

    # 5) channels_last bf16 input through the grouped kernel.
    xb = jax.random.normal(keys[5], (2, 8, 8, C), jnp.float32).astype(jnp.bfloat16)
    yb = jax.block_until_ready(ln_cl(xb))
    assert yb.dtype == jnp.bfloat16
    refb = _reference(xb.astype(jnp.float32), w, b, eps, "channels_last")
    assert jnp.allclose(yb.astype(jnp.float32), refb, atol=3e-2, rtol=3e-2)

    # 6) channels_last with C multiple of 128 — plain lane-dense kernel.
    C2 = 128
    w2, b2 = make_params(C2, keys[6])
    ln_cl2 = LayerNorm(C2, eps=eps, data_format="channels_last", weight=w2, bias=b2)
    x = jax.random.normal(keys[7], (2, 4, 4, C2), jnp.float32)
    y = jax.block_until_ready(ln_cl2(x))
    assert jnp.allclose(y, _reference(x, w2, b2, eps, "channels_last"),
                        atol=1e-5, rtol=1e-5)

    print("KERNEL_OK")
</pallas_src>

<mosaic_0001>
module attributes {stable_mosaic.version = 11 : i64} {
  func.func @_ln_cfirst_kernel(%arg0: i32, %arg1: i32, %arg2: memref<2x32x64xf32, #tpu.memory_space<vmem>>, %arg3: memref<1x32x1xf32, #tpu.memory_space<vmem>>, %arg4: memref<1x32x1xf32, #tpu.memory_space<vmem>>, %arg5: memref<2x32x64xf32, #tpu.memory_space<vmem>>) attributes {dimension_semantics = [#tpu.dimension_semantics<parallel>, #tpu.dimension_semantics<parallel>], iteration_bounds = array<i64: 1, 1>, scalar_prefetch = 0 : i64, scratch_operands = 0 : i64, tpu.core_type = #tpu.core_type<tc>, window_params = [{transform_indices = @transform_0, window_bounds = array<i64: 2, 32, 64>}, {pipeline_mode = #tpu.pipeline_mode<synchronous>, transform_indices = @transform_1, window_bounds = array<i64: 1, 32, 1>}, {pipeline_mode = #tpu.pipeline_mode<synchronous>, transform_indices = @transform_2, window_bounds = array<i64: 1, 32, 1>}, {transform_indices = @transform_3, window_bounds = array<i64: 2, 32, 64>}]} {
    %c0 = arith.constant 0 : index
    %c0_0 = arith.constant 0 : index
    %c0_1 = arith.constant 0 : index
    %0 = vector.load %arg2[%c0, %c0_0, %c0_1] : memref<2x32x64xf32, #tpu.memory_space<vmem>>, vector<2x32x64xf32>
    %cst = arith.constant dense<0.000000e+00> : vector<2x64xf32>
    %1 = vector.multi_reduction <add>, %0, %cst [1] : vector<2x32x64xf32> to vector<2x64xf32>
    %2 = vector.shape_cast %1 : vector<2x64xf32> to vector<2x1x64xf32>
    %cst_2 = arith.constant 3.200000e+01 : f32
    %3 = vector.broadcast %cst_2 : f32 to vector<2x1x64xf32>
    %4 = arith.divf %2, %3 : vector<2x1x64xf32>
    %5 = vector.broadcast %4 : vector<2x1x64xf32> to vector<2x32x64xf32>
    %6 = arith.subf %0, %5 : vector<2x32x64xf32>
    %7 = arith.mulf %6, %6 : vector<2x32x64xf32>
    %cst_3 = arith.constant dense<0.000000e+00> : vector<2x64xf32>
    %8 = vector.multi_reduction <add>, %7, %cst_3 [1] : vector<2x32x64xf32> to vector<2x64xf32>
    %9 = vector.shape_cast %8 : vector<2x64xf32> to vector<2x1x64xf32>
    %cst_4 = arith.constant 3.200000e+01 : f32
    %10 = vector.broadcast %cst_4 : f32 to vector<2x1x64xf32>
    %11 = arith.divf %9, %10 : vector<2x1x64xf32>
    %cst_5 = arith.constant 9.99999997E-7 : f32
    %12 = vector.broadcast %cst_5 : f32 to vector<2x1x64xf32>
    %13 = arith.addf %11, %12 : vector<2x1x64xf32>
    %14 = math.rsqrt %13 : vector<2x1x64xf32>
    %15 = vector.broadcast %14 : vector<2x1x64xf32> to vector<2x32x64xf32>
    %16 = arith.mulf %6, %15 : vector<2x32x64xf32>
    %c0_6 = arith.constant 0 : index
    %c0_7 = arith.constant 0 : index
    %c0_8 = arith.constant 0 : index
    %17 = vector.load %arg3[%c0_6, %c0_7, %c0_8] : memref<1x32x1xf32, #tpu.memory_space<vmem>>, vector<1x32x1xf32>
    %18 = vector.broadcast %17 : vector<1x32x1xf32> to vector<2x32x64xf32>
    %19 = arith.mulf %16, %18 : vector<2x32x64xf32>
    %c0_9 = arith.constant 0 : index
    %c0_10 = arith.constant 0 : index
    %c0_11 = arith.constant 0 : index
    %20 = vector.load %arg4[%c0_9, %c0_10, %c0_11] : memref<1x32x1xf32, #tpu.memory_space<vmem>>, vector<1x32x1xf32>
    %21 = vector.broadcast %20 : vector<1x32x1xf32> to vector<2x32x64xf32>
    %22 = arith.addf %19, %21 : vector<2x32x64xf32>
    %c0_12 = arith.constant 0 : index
    %c0_13 = arith.constant 0 : index
    %c0_14 = arith.constant 0 : index
    %23 = vector.load %arg5[%c0_12, %c0_13, %c0_14] : memref<2x32x64xf32, #tpu.memory_space<vmem>>, vector<2x32x64xf32>
    tpu.vector_store %arg5[%c0_12, %c0_13, %c0_14], %22 {strides = array<i32>} : memref<2x32x64xf32, #tpu.memory_space<vmem>>, vector<2x32x64xf32>,
    return
  }
  func.func @transform_0(%arg0: i32, %arg1: i32) -> (i32, i32, i32) {
    %c0_i32 = arith.constant 0 : i32
    %c0_i32_0 = arith.constant 0 : i32
    return %arg0, %c0_i32, %arg1 : i32, i32, i32
  }
  func.func @transform_1(%arg0: i32, %arg1: i32) -> (i32, i32, i32) {
    %c0_i32 = arith.constant 0 : i32
    %c0_i32_0 = arith.constant 0 : i32
    %c0_i32_1 = arith.constant 0 : i32
    %c0_i32_2 = arith.constant 0 : i32
    return %c0_i32, %c0_i32_0, %c0_i32_1 : i32, i32, i32
  }
  func.func @transform_2(%arg0: i32, %arg1: i32) -> (i32, i32, i32) {
    %c0_i32 = arith.constant 0 : i32
    %c0_i32_0 = arith.constant 0 : i32
    %c0_i32_1 = arith.constant 0 : i32
    %c0_i32_2 = arith.constant 0 : i32
    return %c0_i32, %c0_i32_0, %c0_i32_1 : i32, i32, i32
  }
  func.func @transform_3(%arg0: i32, %arg1: i32) -> (i32, i32, i32) {
    %c0_i32 = arith.constant 0 : i32
    %c0_i32_0 = arith.constant 0 : i32
    return %arg0, %c0_i32, %arg1 : i32, i32, i32
  }
}

</mosaic_0001>

<bundles_post_ra>
// kernel: tpu_custom_call.1
= control target key start
LH: loop header
LB: loop body
LE: loop exit
PB: predicated region body
PF: predicated region fallthrough
CT: control target
= control target key end

     0   :  { %v231_v2 = vmov 0   ;;  %s339_s0 = inlined_call_operand.vmem [shape: f32[2,32,64], index: 0, kind: input, shape index: {}]   ;;  %s340_s1 = inlined_call_operand.vmem [shape: f32[1,32,1], index: 1, kind: input, shape index: {}]   ;;  %s341_s2 = inlined_call_operand.vmem [shape: f32[1,32,1], index: 2, kind: input, shape index: {}]   ;;  %s342_s3 = inlined_call_operand.hbm [shape: f32[2,32,64], index: 3, kind: output, shape index: {}]  }
   0x1   :  { %v111_v0 = vld [vmem:[%s340_s1 + $0x10] sm:$0xff]  ;;  %v109_v1 = vld [vmem:[%s340_s1] sm:$0xff]  ;;  %202 = vset.pattern.permute.xlu1 %v231_v2  ;;  %201 = vset.pattern.permute.xlu0 %v231_v2  ;;  %v112_v3 = vld [vmem:[%s340_s1 + $0x18] sm:$0xff] }
   0x2   :  { %125 = vperm.xlu1 %202, %v111_v0   ;;  %115 = vperm.xlu0 %201, %v109_v1   ;;  %v110_v4 = vld [vmem:[%s340_s1 + $0x8] sm:$0xff] }
   0x3   :  { %8 = vsyncpa [#allocation3], 0  ;;  %v142_v5 = vld [vmem:[%s341_s2 + $0x8] sm:$0xff]  ;;  %v141_v6 = vld [vmem:[%s341_s2] sm:$0xff]  ;;  %vm23_vm0 = vcmask 523264  }
   0x4   :  { %v144_v7 = vld [vmem:[%s341_s2 + $0x18] sm:$0xff]  ;;  %v143_v8 = vld [vmem:[%s341_s2 + $0x10] sm:$0xff]  ;;  %v15_v9 = vld [vmem:[%s339_s0] sm:$0xff] }
   0x5   :  { %v16_v10 = vld [vmem:[%s339_s0 + $0x8] sm:$0xff]  ;;  %v19_v11 = vld [vmem:[%s339_s0 + $0x20] sm:$0xff]  ;;  %v24_v13 = vsel %vm23_vm0, %v15_v9, 0.0  ;;  %v17_v15 = vld [vmem:[%s339_s0 + $0x10] sm:$0xff] }
   0x6   :  { %130 = vperm.xlu1 %202, %v112_v3   ;;  %120 = vperm.xlu0 %201, %v110_v4   ;;  %v20_v12 = vld [vmem:[%s339_s0 + $0x28] sm:$0xff]  ;;  %v25_v14 = vsel %vm23_vm0, %v16_v10, 0.0  ;;  %v37_v16 = vsel %vm23_vm0, %v19_v11, 0.0  ;;  %v21_v18 = vld [vmem:[%s339_s0 + $0x30] sm:$0xff]  ;;  %v27_v20 = vsel %vm23_vm0, %v17_v15, 0.0  ;;  %v18_v22 = vld [vmem:[%s339_s0 + $0x18] sm:$0xff] }
   0x7   :  { %v38_v17 = vsel %vm23_vm0, %v20_v12, 0.0  ;;  %v26_v19 = vadd.f32 %v25_v14, %v24_v13  ;;  %v40_v23 = vsel %vm23_vm0, %v21_v18, 0.0  ;;  %v22_v24 = vld [vmem:[%s339_s0 + $0x38] sm:$0xff]  ;;  %v29_v26 = vsel %vm23_vm0, %v18_v22, 0.0  ;;  %s232_s0 = smov [#allocation2]  }
   0x8   :  { %v39_v21 = vadd.f32 %v38_v17, %v37_v16  ;;  %v42_v28 = vsel %vm23_vm0, %v22_v24, 0.0  ;;  %s186_s15 = sshll.u32 %s232_s0, 4  ;;  %s187_s15 = int_to_ptr.vmem [resolvable:$true] %s186_s15 }
   0x9   :  { %v28_v25 = vadd.f32 %v27_v20, %v26_v19  ;;  %s207_s16 = scalar_lea.vmem %s187_s15, 1024  ;;  %p212_p1 = scmp.lt.s32.totalorder %s187_s15, %s187_s15 }
   0xa   :  { %152 = vperm.xlu1 %202, %v142_v5   ;;  %147 = vperm.xlu0 %201, %v141_v6   ;;  %v41_v27 = vadd.f32 %v40_v23, %v39_v21  ;;  %p208_p0 = scmp.ne.s32.totalorder %s187_s15, %s207_s16  ;;  %p213_p2 = scmp.lt.s32.totalorder %s207_s16, %s207_s16 }
   0xb   :  { %v30_v29 = vadd.f32 %v29_v26, %v28_v25 }
   0xc   :  { %v43_v30 = vadd.f32 %v42_v28, %v41_v27  ;;  %p214_p3 = por %p213_p2, %p212_p1 }
   0xd   :  { %v31_v31 = vrot.slane %v30_v29, 4 }
   0xe   :  { %162 = vperm.xlu1 %202, %v144_v7   ;;  %157 = vperm.xlu0 %201, %v143_v8   ;;  %v44_v32 = vrot.slane %v43_v30, 4  ;;  %p215_p4 = pnand %p214_p3, %p208_p0 }
   0xf   :  { %v32_v33 = vadd.f32 %v31_v31, %v30_v29 }
  0x10   :  { %v45_v34 = vadd.f32 %v44_v32, %v43_v30 }
  0x11   :  { %v33_v35 = vrot.slane %v32_v33, 2 }
  0x12   :  { %v46_v36 = vrot.slane %v45_v34, 2 }
  0x13   :  { %v34_v37 = vadd.f32 %v33_v35, %v32_v33 }
  0x14   :  { %v47_v38 = vadd.f32 %v46_v36, %v45_v34 }
  0x15   :  { %v35_v39 = vrot.slane %v34_v37, 1 }
  0x16   :  { %v48_v40 = vrot.slane %v47_v38, 1 }
  0x17   :  { %v36_v41 = vadd.f32 %v35_v39, %v34_v37 }
  0x18   :  { %v49_v42 = vadd.f32 %v48_v40, %v47_v38 }
  0x19   :  { %v51_v43 = vmul.f32 0.03125, %v36_v41 }
  0x1a   :  { %v52_v44 = vmul.f32 0.03125, %v49_v42 }
  0x1b   :  { %v53_v45 = vsub.f32 %v15_v9, %v51_v43  ;;  %v54_v46 = vsub.f32 %v16_v10, %v51_v43  ;;  %v55_v49 = vsub.f32 %v17_v15, %v51_v43  ;;  %v56_v55 = vsub.f32 %v18_v22, %v51_v43 }
  0x1c   :  { %v57_v47 = vsub.f32 %v19_v11, %v52_v44  ;;  %v58_v48 = vsub.f32 %v20_v12, %v52_v44  ;;  %v59_v52 = vsub.f32 %v21_v18, %v52_v44  ;;  %v60_v59 = vsub.f32 %v22_v24, %v52_v44 }
  0x1d   :  { %v61_v50 = vmul.f32 %v53_v45, %v53_v45  ;;  %v62_v51 = vmul.f32 %v54_v46, %v54_v46  ;;  %v63_v56 = vmul.f32 %v55_v49, %v55_v49  ;;  %v64_v0 = vmul.f32 %v56_v55, %v56_v55 }
  0x1e   :  { %v65_v53 = vmul.f32 %v57_v47, %v57_v47  ;;  %v66_v54 = vmul.f32 %v58_v48, %v58_v48  ;;  %v67_v60 = vmul.f32 %v59_v52, %v59_v52  ;;  %v68_v3 = vmul.f32 %v60_v59, %v60_v59 }
  0x1f   :  { %v69_v57 = vsel %vm23_vm0, %v61_v50, 0.0  ;;  %v70_v58 = vsel %vm23_vm0, %v62_v51, 0.0  ;;  %v72_v1 = vsel %vm23_vm0, %v63_v56, 0.0  ;;  %v74_v6 = vsel %vm23_vm0, %v64_v0, 0.0 }
  0x20   :  { %v82_v61 = vsel %vm23_vm0, %v65_v53, 0.0  ;;  %v83_v62 = vsel %vm23_vm0, %v66_v54, 0.0  ;;  %v71_v63 = vadd.f32 %v70_v58, %v69_v57  ;;  %v85_v4 = vsel %vm23_vm0, %v67_v60, 0.0 }
  0x21   :  { %v84_v2 = vadd.f32 %v83_v62, %v82_v61  ;;  %v87_v8 = vsel %vm23_vm0, %v68_v3, 0.0 }
  0x22   :  { %v73_v5 = vadd.f32 %v72_v1, %v71_v63 }
  0x23   :  { %v86_v7 = vadd.f32 %v85_v4, %v84_v2 }
  0x24   :  { %v75_v9 = vadd.f32 %v74_v6, %v73_v5 }
  0x25   :  { %v88_v10 = vadd.f32 %v87_v8, %v86_v7 }
  0x26   :  { %v76_v11 = vrot.slane %v75_v9, 4 }
  0x27   :  { %v89_v12 = vrot.slane %v88_v10, 4 }
  0x28   :  { %v77_v13 = vadd.f32 %v76_v11, %v75_v9 }
  0x29   :  { %v90_v14 = vadd.f32 %v89_v12, %v88_v10 }
  0x2a   :  { %v78_v15 = vrot.slane %v77_v13, 2 }
  0x2b   :  { %v91_v16 = vrot.slane %v90_v14, 2 }
  0x2c   :  { %v79_v17 = vadd.f32 %v78_v15, %v77_v13 }
  0x2d   :  { %v92_v18 = vadd.f32 %v91_v16, %v90_v14 }
  0x2e   :  { %v80_v19 = vrot.slane %v79_v17, 1 }
  0x2f   :  { %v93_v20 = vrot.slane %v92_v18, 1 }
  0x30   :  { %v81_v21 = vadd.f32 %v80_v19, %v79_v17 }
  0x31   :  { %v94_v22 = vadd.f32 %v93_v20, %v92_v18 }
  0x32   :  { %v95_v23 = vmul.f32 0.03125, %v81_v21 }
  0x33   :  { %v96_v24 = vmul.f32 0.03125, %v94_v22 }
  0x34   :  { %v97_v25 = vadd.f32 1e-06, %v95_v23 }
  0x35   :  { %v98_v26 = vadd.f32 1e-06, %v96_v24 }
  0x36   :  { %203 = vrsqrt.f32 %v97_v25 }
  0x37   :  { %205 = vrsqrt.f32 %v98_v26 }
  0x40   :  { %v204_v27 = vpop.eup %203 }
  0x41   :  { %v206_v28 = vpop.eup %205  ;;  %v101_v31 = vmul.f32 %v204_v27, %v53_v45  ;;  %v102_v33 = vmul.f32 %v204_v27, %v54_v46  ;;  %v103_v37 = vmul.f32 %v204_v27, %v55_v49  ;;  %v104_v39 = vmul.f32 %v204_v27, %v56_v55 }
  0x42   :  { %v105_v32 = vmul.f32 %v206_v28, %v57_v47  ;;  %v106_v34 = vmul.f32 %v206_v28, %v58_v48  ;;  %v107_v38 = vmul.f32 %v206_v28, %v59_v52  ;;  %v108_v40 = vmul.f32 %v206_v28, %v60_v59 }
  0x81   :  { %v126_v29 = vpop.permute.xlu1 %125  ;;  %v116_v30 = vpop.permute.xlu0 %115 }
  0x82   :  { %v133_v41 = vmul.f32 %v116_v30, %v101_v31  ;;  %v137_v42 = vmul.f32 %v116_v30, %v105_v32  ;;  %v135_v45 = vmul.f32 %v126_v29, %v103_v37  ;;  %v139_v46 = vmul.f32 %v126_v29, %v107_v38 }
  0x85   :  { %v131_v35 = vpop.permute.xlu1 %130  ;;  %v121_v36 = vpop.permute.xlu0 %120 }
  0x86   :  { %v134_v43 = vmul.f32 %v121_v36, %v102_v33  ;;  %v138_v44 = vmul.f32 %v121_v36, %v106_v34  ;;  %v136_v47 = vmul.f32 %v131_v35, %v104_v39  ;;  %v140_v48 = vmul.f32 %v131_v35, %v108_v40 }
  0x89   :  { %v153_v50 = vpop.permute.xlu1 %152  ;;  %v148_v51 = vpop.permute.xlu0 %147 }
  0x8a   :  { %v166_v53 = vadd.f32 %v153_v50, %v134_v43  ;;  %v170_v54 = vadd.f32 %v153_v50, %v138_v44  ;;  %v165_v56 = vadd.f32 %v148_v51, %v133_v41  ;;  %v169_v57 = vadd.f32 %v148_v51, %v137_v42 }
  0x8c   :  { %174 = vst.msk [vmem:[#allocation2 + $0x8] sm:$0xff] %vm23_vm0, %v166_v53  ;;  %178 = vst.msk [vmem:[#allocation2 + $0x28] sm:$0xff] %vm23_vm0, %v170_v54 }
  0x8d   :  { %173 = vst.msk [vmem:[#allocation2] sm:$0xff] %vm23_vm0, %v165_v56  ;;  %177 = vst.msk [vmem:[#allocation2 + $0x20] sm:$0xff] %vm23_vm0, %v169_v57  ;;  %v163_v49 = vpop.permute.xlu1 %162  ;;  %v158_v52 = vpop.permute.xlu0 %157 }
  0x8e   :  { %v168_v55 = vadd.f32 %v163_v49, %v136_v47  ;;  %v172_v58 = vadd.f32 %v163_v49, %v140_v48  ;;  %v167_v59 = vadd.f32 %v158_v52, %v135_v45  ;;  %v171_v60 = vadd.f32 %v158_v52, %v139_v46 }
  0x90   :  { %176 = vst.msk [vmem:[#allocation2 + $0x18] sm:$0xff] %vm23_vm0, %v168_v55  ;;  %180 = vst.msk [vmem:[#allocation2 + $0x38] sm:$0xff] %vm23_vm0, %v172_v58 }
  0x91   :  { %175 = vst.msk [vmem:[#allocation2 + $0x10] sm:$0xff] %vm23_vm0, %v167_v59  ;;  %179 = vst.msk [vmem:[#allocation2 + $0x30] sm:$0xff] %vm23_vm0, %v171_v60 }
  0x92   :  { %218 = shalt.err (!%p215_p4)
}
  0x93   :  { %s219_s19 = scalar_lea.hbm %s342_s3, 1024 }
  0x94   :  { %p220_p5 = scmp.ne.s32.totalorder %s342_s3, %s219_s19  ;;  %p223_p6 = scmp.lt.u32.totalorder %s219_s19, %s342_s3 }
  0x96   :  { %p225_p7 = pnand %p223_p6, %p220_p5 }
  0x98   :  { %228 = shalt.err (!%p225_p7)
}
  0x99   :  { %s233_s24 = smov 128   ;;  %s234_s25 = smov 8  }
  0x9a   :  { %192 = dma.vmem_to_hbm [thread:$0]  %s187_s15, 1024, %s342_s3, [#allocation3], %s233_s24, %s233_s24, %s234_s25  }
  0x9b   :  { %229 = dma.done.wait [#allocation3], 1024  }
  0x9c   :  { %230 = vsyncadd [#allocation3], 4294966272 }
  0x9d   :  { %196 = vsyncpa [#allocation3], 1 }

</bundles_post_ra>
